<compile_context>
chip_gen: v5e
topology: v5e:2x2
jax: 0.10.0
libtpu: 0.0.40
codegen_flags: <defaults>
</compile_context>

<pallas_src>
import math

import jax
import jax.numpy as jnp
from jax.experimental import pallas as pl
from jax.experimental.pallas import tpu as pltpu


def _broadcast_kernel(est_ref, out_ref):
    # est_ref: (tr, tl) parameter tile (resident across the inner batch axis).
    # out_ref: (tb, tr, tl) output block — one copy of the tile per batch row.
    out_ref[...] = jnp.broadcast_to(est_ref[...][None], out_ref.shape)


def _choose_layout(param_shape):
    """View the parameter as a 2-D (R, L) slab with a lane-friendly L."""
    feat = math.prod(param_shape) if param_shape else 1
    if feat % 128 == 0:
        # Perfect lane density: 128-wide rows -> unmasked full-width stores,
        # full sublane usage even for tiny batches.
        return feat // 128, 128
    if len(param_shape) >= 2:
        return math.prod(param_shape[:-1]), param_shape[-1]
    # 1-D / scalar fallback: may be lane-masked, but these cases are tiny.
    # TODO(synk): scalar estimate (shape ()) stores only 1/128 lanes per vst;
    # a plain jnp.broadcast_to would be optimal there.
    return 1, feat


def constant_predictor_forward(x, estimate):
    """Pallas implementation of ConstantPredictor.forward.

    x:        any array; only x.shape[0] (batch size) is used.
    estimate: float32 parameter of arbitrary shape.
    returns:  (B, *estimate.shape), out[b] == estimate.
    """
    batch_size = int(x.shape[0])
    param_shape = tuple(estimate.shape)
    dtype = estimate.dtype
    itemsize = jnp.dtype(dtype).itemsize

    R, L = _choose_layout(param_shape)
    est2d = estimate.reshape(R, L)

    EST_BLOCK_BUDGET = 4 * 1024 * 1024    # parameter tile (double-buffered by Pallas)
    OUT_BLOCK_BUDGET = 12 * 1024 * 1024   # output block   (double-buffered by Pallas)

    # ---- parameter tile (tr, tl): last two dims must be (mult. of 8, mult. of
    #      128) or the full extent; always *clamped* to the budget.
    min_tr = R if R < 8 else 8
    if min_tr * L * itemsize <= EST_BLOCK_BUDGET:
        tl = L
        max_tr = EST_BLOCK_BUDGET // (L * itemsize)
        if max_tr >= R:
            tr = R
        else:
            tr = (max_tr // 8) * 8            # >= 8 guaranteed (min_tr=8 fits)
    else:
        tr = min_tr                           # rows are huge: tile the lane axis
        max_tl = EST_BLOCK_BUDGET // (tr * itemsize)
        tl = (max_tl // 128) * 128            # >= 128 guaranteed (tr <= 8)

    est_block_bytes = tr * tl * itemsize

    # ---- batch block: as many batch rows per output block as the budget allows.
    tb = max(1, min(batch_size, OUT_BLOCK_BUDGET // est_block_bytes))

    nr = pl.cdiv(R, tr)
    nl = pl.cdiv(L, tl)
    nb = pl.cdiv(batch_size, tb)

    # v7x megacore: a 1-step grid leaves one TensorCore idle; split the batch
    # when the output is big enough for the extra grid step to pay off.
    total_out_bytes = batch_size * R * L * itemsize
    if nr * nl * nb == 1 and batch_size >= 2 and total_out_bytes >= (2 << 20):
        tb = pl.cdiv(batch_size, 2)
        nb = pl.cdiv(batch_size, tb)

    out3d = pl.pallas_call(
        _broadcast_kernel,
        out_shape=jax.ShapeDtypeStruct((batch_size, R, L), dtype),
        grid_spec=pltpu.PrefetchScalarGridSpec(
            num_scalar_prefetch=0,
            # Batch innermost: the parameter tile's block index is constant
            # along it, so the tile stays resident (no re-DMA per batch block).
            grid=(nr, nl, nb),
            in_specs=[
                pl.BlockSpec((tr, tl), lambda r, l, b: (r, l)),
            ],
            out_specs=pl.BlockSpec((tb, tr, tl), lambda r, l, b: (b, r, l)),
        ),
        compiler_params=pltpu.CompilerParams(
            dimension_semantics=("parallel", "parallel", "parallel"),
            # Worst case usage: 2*12 MiB (out) + 2*4 MiB (param) = 32 MiB.
            # 40 MiB fits v7x's 64 MiB physical VMEM and overrides v5e's
            # 16 MiB scoped default.
            vmem_limit_bytes=40 * 1024 * 1024,
        ),
        cost_estimate=pl.CostEstimate(
            flops=0,
            transcendentals=0,
            bytes_accessed=int((batch_size + 1) * R * L * itemsize),
        ),
    )(est2d)

    return out3d.reshape((batch_size,) + param_shape)


if __name__ == "__main__":
    key = jax.random.PRNGKey(0)
    k_est, k_x = jax.random.split(key)

    # Parameter shape for the synthetic test (module __init__ takes `shape`);
    # PyTorch inits to zeros — use random values so the broadcast is exercised.
    H, W = 16, 128
    estimate = jax.random.normal(k_est, (H, W), dtype=jnp.float32)

    # Dummy input: only its batch dim matters.
    x = jax.random.normal(k_x, (2, 4, 16, 16), dtype=jnp.float32)

    out = constant_predictor_forward(x, estimate)
    out = jax.block_until_ready(out)

    # Correctness check against the trivial JAX reference.
    ref = jnp.broadcast_to(estimate[None], (x.shape[0], H, W))
    assert out.shape == (x.shape[0], H, W)
    assert out.dtype == jnp.float32
    assert bool(jnp.allclose(out, ref)), "mismatch vs reference broadcast"

    print("KERNEL_OK")
</pallas_src>

<mosaic_0001>
module attributes {stable_mosaic.version = 11 : i64} {
  func.func @_broadcast_kernel(%arg0: i32, %arg1: i32, %arg2: i32, %arg3: memref<16x128xf32, #tpu.memory_space<vmem>>, %arg4: memref<2x16x128xf32, #tpu.memory_space<vmem>>) attributes {dimension_semantics = [#tpu.dimension_semantics<parallel>, #tpu.dimension_semantics<parallel>, #tpu.dimension_semantics<parallel>], iteration_bounds = array<i64: 1, 1, 1>, scalar_prefetch = 0 : i64, scratch_operands = 0 : i64, tpu.core_type = #tpu.core_type<tc>, window_params = [{transform_indices = @transform_0, window_bounds = array<i64: 16, 128>}, {transform_indices = @transform_1, window_bounds = array<i64: 2, 16, 128>}]} {
    %c0 = arith.constant 0 : index
    %c0_0 = arith.constant 0 : index
    %0 = vector.load %arg3[%c0, %c0_0] : memref<16x128xf32, #tpu.memory_space<vmem>>, vector<16x128xf32>
    %1 = vector.shape_cast %0 : vector<16x128xf32> to vector<1x16x128xf32>
    %2 = vector.shape_cast %1 : vector<1x16x128xf32> to vector<1x16x128xf32>
    %3 = vector.broadcast %2 : vector<1x16x128xf32> to vector<2x16x128xf32>
    %c0_1 = arith.constant 0 : index
    %c0_2 = arith.constant 0 : index
    %c0_3 = arith.constant 0 : index
    %4 = vector.load %arg4[%c0_1, %c0_2, %c0_3] : memref<2x16x128xf32, #tpu.memory_space<vmem>>, vector<2x16x128xf32>
    tpu.vector_store %arg4[%c0_1, %c0_2, %c0_3], %3 {strides = array<i32>} : memref<2x16x128xf32, #tpu.memory_space<vmem>>, vector<2x16x128xf32>,
    return
  }
  func.func @transform_0(%arg0: i32, %arg1: i32, %arg2: i32) -> (i32, i32) {
    %c0_i32 = arith.constant 0 : i32
    return %arg0, %arg1 : i32, i32
  }
  func.func @transform_1(%arg0: i32, %arg1: i32, %arg2: i32) -> (i32, i32, i32) {
    %c0_i32 = arith.constant 0 : i32
    return %arg2, %arg0, %arg1 : i32, i32, i32
  }
}

</mosaic_0001>

<bundles_post_ra>
// kernel: tpu_custom_call.1
= control target key start
LH: loop header
LB: loop body
LE: loop exit
PB: predicated region body
PF: predicated region fallthrough
CT: control target
= control target key end

     0   :  { %6 = vsyncpa [#allocation3], 0  ;;  %s126_s0 = inlined_call_operand.hbm [shape: f32[16,128], index: 0, kind: input, shape index: {}]   ;;  %s127_s1 = inlined_call_operand.hbm [shape: f32[2,16,128], index: 1, kind: output, shape index: {}]  }
   0x1   :  { %7 = vsyncpa [#allocation4], 0  ;;  %s12_s8 = sshll.u32 %s126_s0, 4  ;;  %s106_s9 = smov [#allocation2]   ;;  %s13_s8 = int_to_ptr.hbm [resolvable:$true] %s12_s8 }
   0x2   :  { %s14_s10 = sshll.u32 %s106_s9, 4  ;;  %s107_s11 = smov 128   ;;  %s15_s10 = int_to_ptr.vmem [resolvable:$true] %s14_s10 }
   0x3   :  { %s108_s12 = smov 8  }
   0x4   :  { %20 = dma.hbm_to_vmem [thread:$0]  %s13_s8, 256, %s15_s10, [#allocation3], %s107_s11, %s107_s11, %s108_s12  }
   0x5   :  { %102 = dma.done.wait [#allocation3], 256  }
   0x6   :  { %103 = vsyncadd [#allocation3], 4294967040  ;;  %s109_s13 = smov [#allocation5]   ;;  %s37_s17 = sshll.u32 %s127_s1, 4  ;;  %v25_v0 = vld [vmem:[#allocation2] sm:$0xff]  ;;  %v26_v1 = vld [vmem:[#allocation2 + $0x8] sm:$0xff]  ;;  %s38_s17 = int_to_ptr.hbm [resolvable:$true] %s37_s17 }
   0x7   :  { %s35_s14 = sshll.u32 %s109_s13, 4  ;;  %27 = vst [vmem:[#allocation5] sm:$0xff] %v25_v0  ;;  %s36_s14 = int_to_ptr.vmem [resolvable:$true] %s35_s14 }
   0x8   :  { %29 = vst [vmem:[#allocation5 + $0x10] sm:$0xff] %v25_v0 }
   0x9   :  { %28 = vst [vmem:[#allocation5 + $0x8] sm:$0xff] %v26_v1 }
   0xa   :  { %30 = vst [vmem:[#allocation5 + $0x18] sm:$0xff] %v26_v1 }
   0xb   :  { %43 = dma.vmem_to_hbm [thread:$0]  %s36_s14, 512, %s38_s17, [#allocation4], %s107_s11, %s107_s11, %s108_s12  }
   0xc   :  { %104 = dma.done.wait [#allocation4], 512  }
   0xd   :  { %105 = vsyncadd [#allocation4], 4294966784 }
   0xe   :  { %48 = vsyncpa [#allocation3], 1 }
   0xf   :  { %49 = vsyncpa [#allocation4], 1 }

</bundles_post_ra>
